<compile_context>
chip_gen: v7x
topology: tpu7x:2x2x1
jax: 0.10.0
libtpu: 0.0.40
codegen_flags: <defaults>
</compile_context>

<pallas_src>
import functools

import jax
import jax.numpy as jnp
from jax.experimental import pallas as pl
from jax.experimental.pallas import tpu as pltpu

EPS = 1e-5


def _mlp_kernel(x_ref, w1_ref, s1_ref, b1_ref, w2_ref, s2_ref, b2_ref, w3_ref, b3_ref,
                o_ref):
    # x: (TILE_B, 384) in its HBM dtype; weights w1/w2 bf16 (unscaled); s/b f32; b3 SMEM.
    x = x_ref[...].astype(jnp.bfloat16)          # VPU cast, hidden under the x DMA

    # ---- Layer 1: Linear(384 -> 256) + BN(eval, scale/shift in f32) + ReLU ----
    h1 = jnp.dot(x, w1_ref[...], preferred_element_type=jnp.float32)
    h1 = jnp.maximum(h1 * s1_ref[...] + b1_ref[...], 0.0)

    # ---- Layer 2: Linear(256 -> 128) + BN(eval) + ReLU ----
    h2 = jnp.dot(h1.astype(jnp.bfloat16), w2_ref[...],
                 preferred_element_type=jnp.float32)
    h2 = jnp.maximum(h2 * s2_ref[...] + b2_ref[...], 0.0)

    # ---- Head: logits row = w3 @ h2^T  (trans-B dot_general, MXU) -> lane-dense (1, T) ----
    logits = jax.lax.dot_general(
        w3_ref[...], h2, (((1,), (1,)), ((), ())),
        preferred_element_type=jnp.float32) + b3_ref[0]

    # Exact sigmoid (EUP exp + exact divide) -> f32 probabilities, lane-dense store.
    o_ref[...] = 1.0 / (1.0 + jnp.exp(-logits))


@functools.partial(jax.jit, static_argnames=("tile_b",))
def hate_speech_mlp_forward(x, prepared, tile_b=2048):
    """x: (B, 384) f32 or bf16.  prepared: tuple from prepare_params().  Returns (B, 1) f32."""
    w1, s1, b1, w2, s2, b2, w3, b3 = prepared
    B, D = x.shape
    H1, H2 = w1.shape[1], w2.shape[1]

    # Lane-dense tile (multiple of 128); keep >= 2 grid steps when possible (v7x has 2 TCs).
    tile_b = pl.cdiv(tile_b, 128) * 128
    two_step_cap = pl.cdiv(pl.cdiv(B, 2), 128) * 128
    tile_b = max(128, min(tile_b, two_step_cap))
    num_tiles = pl.cdiv(B, tile_b)

    # Static VMEM estimate: double-buffered x tiles + f32/bf16 intermediates + resident
    # weights + lane-dense out tiles + slack.  Only ever *raise* the scoped limit.
    x_bytes = tile_b * D * x.dtype.itemsize
    inter_bytes = tile_b * (H1 * 4 + H1 * 2 + H2 * 4 + D * 2)
    w_bytes = (D * H1 + H1 * H2) * 2 + 6 * (H1 + H2) * 4
    vmem_est = 2 * x_bytes + 2 * inter_bytes + w_bytes + 4 * tile_b * 4 + (4 << 20)
    vmem_limit = int(min(max(vmem_est, 32 << 20), 56 << 20))

    resident = lambda shape: pl.BlockSpec(shape, lambda i: (0, 0))  # stays in VMEM

    out = pl.pallas_call(
        _mlp_kernel,
        out_shape=jax.ShapeDtypeStruct((1, num_tiles * tile_b), jnp.float32),
        grid=(num_tiles,),
        in_specs=[
            # x streamed tile-by-tile, auto double-buffered; ragged tail handled by Pallas.
            pl.BlockSpec((tile_b, D), lambda i: (i, 0)),
            resident((D, H1)),   # w1 (bf16, unscaled)
            resident((1, H1)),   # s1 = gamma1 / sqrt(var1 + eps)  (f32)
            resident((1, H1)),   # b1' = (b1 - mean1) * s1 + beta1 (f32)
            resident((H1, H2)),  # w2 (bf16, unscaled)
            resident((1, H2)),   # s2
            resident((1, H2)),   # b2'
            resident((1, H2)),   # w3 row (f32)
            pl.BlockSpec(memory_space=pltpu.MemorySpace.SMEM),  # b3 scalar
        ],
        out_specs=pl.BlockSpec((1, tile_b), lambda i: (0, i)),  # lane-dense output row
        compiler_params=pltpu.CompilerParams(
            dimension_semantics=("parallel",),
            vmem_limit_bytes=vmem_limit,
        ),
    )(x, w1, s1, b1, w2, s2, b2, w3, b3)
    return out.reshape(-1)[:B].reshape(B, 1)


def prepare_params(p, eps=EPS, matmul_dtype=jnp.bfloat16):
    """One-time prep: eval-mode BN folded into per-channel f32 scale/shift; weights bf16."""
    s1 = (p["g1"] * jax.lax.rsqrt(p["v1"] + eps)).astype(jnp.float32)     # (1, 256)
    b1 = ((p["b1"] - p["m1"]) * s1 + p["beta1"]).astype(jnp.float32)      # (1, 256)
    s2 = (p["g2"] * jax.lax.rsqrt(p["v2"] + eps)).astype(jnp.float32)     # (1, 128)
    b2 = ((p["b2"] - p["m2"]) * s2 + p["beta2"]).astype(jnp.float32)      # (1, 128)
    w1 = p["w1"].astype(matmul_dtype)                                     # (384, 256)
    w2 = p["w2"].astype(matmul_dtype)                                     # (256, 128)
    w3 = p["w3"].T.astype(jnp.float32)                                    # (1, 128)
    b3 = p["b3"].reshape(1).astype(jnp.float32)                           # (1,) SMEM scalar
    return (w1, s1, b1, w2, s2, b2, w3, b3)


def init_params(key, input_dim=384, hidden_dims=(256, 128)):
    """Deterministic init matching the module's parameter shapes.
    Linear weights stored as (in, out) (PyTorch weight transposed)."""
    dims = [input_dim, *hidden_dims, 1]
    params = {}
    keys = jax.random.split(key, 6)
    for i in range(3):
        fan_in, fan_out = dims[i], dims[i + 1]
        bound = 1.0 / jnp.sqrt(fan_in)
        params[f"w{i+1}"] = jax.random.uniform(
            keys[2 * i], (fan_in, fan_out), jnp.float32, -bound, bound)
        params[f"b{i+1}"] = jax.random.uniform(
            keys[2 * i + 1], (1, fan_out), jnp.float32, -bound, bound)
    # BatchNorm1d parameters / running stats at their PyTorch init values.
    for i, h in enumerate(hidden_dims, start=1):
        params[f"g{i}"] = jnp.ones((1, h), jnp.float32)      # weight (gamma)
        params[f"beta{i}"] = jnp.zeros((1, h), jnp.float32)  # bias (beta)
        params[f"m{i}"] = jnp.zeros((1, h), jnp.float32)     # running_mean
        params[f"v{i}"] = jnp.ones((1, h), jnp.float32)      # running_var
    return params


def reference_forward(x, p):
    """Plain-JAX f32 reference (eval-mode BN, identity dropout) for validation."""
    h = jnp.maximum((x @ p["w1"] + p["b1"] - p["m1"])
                    * (p["g1"] / jnp.sqrt(p["v1"] + EPS)) + p["beta1"], 0.0)
    h = jnp.maximum((h @ p["w2"] + p["b2"] - p["m2"])
                    * (p["g2"] / jnp.sqrt(p["v2"] + EPS)) + p["beta2"], 0.0)
    return jax.nn.sigmoid(h @ p["w3"] + p["b3"])


if __name__ == "__main__":
    key = jax.random.PRNGKey(0)
    k_x, k_p = jax.random.split(key)

    # Small but deliberately NOT a multiple of the tile: exercises the multi-tile grid,
    # the ragged boundary block, and the lane-dense output reassembly.
    B, D = 300, 384
    x = jax.random.normal(k_x, (B, D), jnp.float32)   # f32 input, cast to bf16 in-kernel
    params = init_params(k_p, input_dim=D, hidden_dims=(256, 128))
    prepared = prepare_params(params)

    out = hate_speech_mlp_forward(x, prepared, tile_b=128)   # 3 grid steps at this toy size
    out = jax.block_until_ready(out)

    ref = reference_forward(x, params)
    assert out.shape == (B, 1)
    # bf16 MXU operands with f32 accumulation and exact sigmoid -> modest tolerance.
    assert jnp.allclose(out, ref, atol=1e-2, rtol=1e-2), "mismatch vs reference"
    print("KERNEL_OK")
</pallas_src>

<mosaic_0001>
module attributes {stable_mosaic.version = 11 : i64} {
  func.func @_mlp_kernel(%arg0: i32, %arg1: memref<128x384xf32, #tpu.memory_space<vmem>>, %arg2: memref<384x256xbf16, #tpu.memory_space<vmem>>, %arg3: memref<1x256xf32, #tpu.memory_space<vmem>>, %arg4: memref<1x256xf32, #tpu.memory_space<vmem>>, %arg5: memref<256x128xbf16, #tpu.memory_space<vmem>>, %arg6: memref<1x128xf32, #tpu.memory_space<vmem>>, %arg7: memref<1x128xf32, #tpu.memory_space<vmem>>, %arg8: memref<1x128xf32, #tpu.memory_space<vmem>>, %arg9: memref<1xf32, #tpu.memory_space<smem>>, %arg10: memref<1x128xf32, #tpu.memory_space<vmem>>) attributes {dimension_semantics = [#tpu.dimension_semantics<parallel>], iteration_bounds = array<i64: 3>, scalar_prefetch = 0 : i64, scratch_operands = 0 : i64, tpu.core_type = #tpu.core_type<tc>, window_params = [{transform_indices = @transform_0, window_bounds = array<i64: 128, 384>}, {pipeline_mode = #tpu.pipeline_mode<synchronous>, transform_indices = @transform_1, window_bounds = array<i64: 384, 256>}, {pipeline_mode = #tpu.pipeline_mode<synchronous>, transform_indices = @transform_2, window_bounds = array<i64: 1, 256>}, {pipeline_mode = #tpu.pipeline_mode<synchronous>, transform_indices = @transform_3, window_bounds = array<i64: 1, 256>}, {pipeline_mode = #tpu.pipeline_mode<synchronous>, transform_indices = @transform_4, window_bounds = array<i64: 256, 128>}, {pipeline_mode = #tpu.pipeline_mode<synchronous>, transform_indices = @transform_5, window_bounds = array<i64: 1, 128>}, {pipeline_mode = #tpu.pipeline_mode<synchronous>, transform_indices = @transform_6, window_bounds = array<i64: 1, 128>}, {pipeline_mode = #tpu.pipeline_mode<synchronous>, transform_indices = @transform_7, window_bounds = array<i64: 1, 128>}, {transform_indices = @transform_8, window_bounds = array<i64: 1>}, {transform_indices = @transform_9, window_bounds = array<i64: 1, 128>}]} {
    %c0 = arith.constant 0 : index
    %c0_0 = arith.constant 0 : index
    %0 = vector.load %arg1[%c0, %c0_0] : memref<128x384xf32, #tpu.memory_space<vmem>>, vector<128x384xf32>
    %1 = arith.truncf %0 : vector<128x384xf32> to vector<128x384xbf16>
    %c0_1 = arith.constant 0 : index
    %c0_2 = arith.constant 0 : index
    %2 = vector.load %arg2[%c0_1, %c0_2] : memref<384x256xbf16, #tpu.memory_space<vmem>>, vector<384x256xbf16>
    %cst = arith.constant dense<0.000000e+00> : vector<128x256xf32>
    %3 = tpu.matmul %1, %2, %cst {dimension_numbers = #tpu.dot_dimension_numbers<[1], [0], [0], [1], [0, 0, 1, 1], [], []>} : vector<128x384xbf16>, vector<384x256xbf16>, vector<128x256xf32> -> vector<128x256xf32>
    %c0_3 = arith.constant 0 : index
    %c0_4 = arith.constant 0 : index
    %4 = vector.load %arg3[%c0_3, %c0_4] : memref<1x256xf32, #tpu.memory_space<vmem>>, vector<1x256xf32>
    %5 = vector.broadcast %4 : vector<1x256xf32> to vector<128x256xf32>
    %6 = arith.mulf %3, %5 : vector<128x256xf32>
    %c0_5 = arith.constant 0 : index
    %c0_6 = arith.constant 0 : index
    %7 = vector.load %arg4[%c0_5, %c0_6] : memref<1x256xf32, #tpu.memory_space<vmem>>, vector<1x256xf32>
    %8 = vector.broadcast %7 : vector<1x256xf32> to vector<128x256xf32>
    %9 = arith.addf %6, %8 : vector<128x256xf32>
    %cst_7 = arith.constant 0.000000e+00 : f32
    %10 = vector.broadcast %cst_7 : f32 to vector<128x256xf32>
    %11 = arith.maximumf %9, %10 : vector<128x256xf32>
    %12 = arith.truncf %11 : vector<128x256xf32> to vector<128x256xbf16>
    %c0_8 = arith.constant 0 : index
    %c0_9 = arith.constant 0 : index
    %13 = vector.load %arg5[%c0_8, %c0_9] : memref<256x128xbf16, #tpu.memory_space<vmem>>, vector<256x128xbf16>
    %cst_10 = arith.constant dense<0.000000e+00> : vector<128x128xf32>
    %14 = tpu.matmul %12, %13, %cst_10 {dimension_numbers = #tpu.dot_dimension_numbers<[1], [0], [0], [1], [0, 0, 1, 1], [], []>} : vector<128x256xbf16>, vector<256x128xbf16>, vector<128x128xf32> -> vector<128x128xf32>
    %c0_11 = arith.constant 0 : index
    %c0_12 = arith.constant 0 : index
    %15 = vector.load %arg6[%c0_11, %c0_12] : memref<1x128xf32, #tpu.memory_space<vmem>>, vector<1x128xf32>
    %16 = vector.broadcast %15 : vector<1x128xf32> to vector<128x128xf32>
    %17 = arith.mulf %14, %16 : vector<128x128xf32>
    %c0_13 = arith.constant 0 : index
    %c0_14 = arith.constant 0 : index
    %18 = vector.load %arg7[%c0_13, %c0_14] : memref<1x128xf32, #tpu.memory_space<vmem>>, vector<1x128xf32>
    %19 = vector.broadcast %18 : vector<1x128xf32> to vector<128x128xf32>
    %20 = arith.addf %17, %19 : vector<128x128xf32>
    %cst_15 = arith.constant 0.000000e+00 : f32
    %21 = vector.broadcast %cst_15 : f32 to vector<128x128xf32>
    %22 = arith.maximumf %20, %21 : vector<128x128xf32>
    %c0_16 = arith.constant 0 : index
    %c0_17 = arith.constant 0 : index
    %23 = vector.load %arg8[%c0_16, %c0_17] : memref<1x128xf32, #tpu.memory_space<vmem>>, vector<1x128xf32>
    %cst_18 = arith.constant dense<0.000000e+00> : vector<1x128xf32>
    %24 = tpu.matmul %23, %22, %cst_18 {dimension_numbers = #tpu.dot_dimension_numbers<[1], [1], [0], [0], [0, 0, 1, 0], [], []>} : vector<1x128xf32>, vector<128x128xf32>, vector<1x128xf32> -> vector<1x128xf32>
    %c0_19 = arith.constant 0 : index
    %25 = memref.load %arg9[%c0_19] : memref<1xf32, #tpu.memory_space<smem>>
    %26 = vector.broadcast %25 : f32 to vector<1x128xf32>
    %27 = arith.addf %24, %26 : vector<1x128xf32>
    %cst_20 = arith.constant 0.000000e+00 : f32
    %28 = vector.broadcast %cst_20 : f32 to vector<1x128xf32>
    %29 = arith.subf %28, %27 : vector<1x128xf32>
    %30 = math.exp %29 : vector<1x128xf32>
    %cst_21 = arith.constant 1.000000e+00 : f32
    %31 = vector.broadcast %cst_21 : f32 to vector<1x128xf32>
    %32 = arith.addf %31, %30 : vector<1x128xf32>
    %cst_22 = arith.constant 1.000000e+00 : f32
    %33 = vector.broadcast %cst_22 : f32 to vector<1x128xf32>
    %34 = arith.divf %33, %32 : vector<1x128xf32>
    %c0_23 = arith.constant 0 : index
    %c0_24 = arith.constant 0 : index
    %35 = vector.load %arg10[%c0_23, %c0_24] : memref<1x128xf32, #tpu.memory_space<vmem>>, vector<1x128xf32>
    tpu.vector_store %arg10[%c0_23, %c0_24], %34 {strides = array<i32>} : memref<1x128xf32, #tpu.memory_space<vmem>>, vector<1x128xf32>,
    return
  }
  func.func @transform_0(%arg0: i32) -> (i32, i32) {
    %c0_i32 = arith.constant 0 : i32
    %c0_i32_0 = arith.constant 0 : i32
    return %arg0, %c0_i32 : i32, i32
  }
  func.func @transform_1(%arg0: i32) -> (i32, i32) {
    %c0_i32 = arith.constant 0 : i32
    %c0_i32_0 = arith.constant 0 : i32
    %c0_i32_1 = arith.constant 0 : i32
    return %c0_i32, %c0_i32_0 : i32, i32
  }
  func.func @transform_2(%arg0: i32) -> (i32, i32) {
    %c0_i32 = arith.constant 0 : i32
    %c0_i32_0 = arith.constant 0 : i32
    %c0_i32_1 = arith.constant 0 : i32
    return %c0_i32, %c0_i32_0 : i32, i32
  }
  func.func @transform_3(%arg0: i32) -> (i32, i32) {
    %c0_i32 = arith.constant 0 : i32
    %c0_i32_0 = arith.constant 0 : i32
    %c0_i32_1 = arith.constant 0 : i32
    return %c0_i32, %c0_i32_0 : i32, i32
  }
  func.func @transform_4(%arg0: i32) -> (i32, i32) {
    %c0_i32 = arith.constant 0 : i32
    %c0_i32_0 = arith.constant 0 : i32
    %c0_i32_1 = arith.constant 0 : i32
    return %c0_i32, %c0_i32_0 : i32, i32
  }
  func.func @transform_5(%arg0: i32) -> (i32, i32) {
    %c0_i32 = arith.constant 0 : i32
    %c0_i32_0 = arith.constant 0 : i32
    %c0_i32_1 = arith.constant 0 : i32
    return %c0_i32, %c0_i32_0 : i32, i32
  }
  func.func @transform_6(%arg0: i32) -> (i32, i32) {
    %c0_i32 = arith.constant 0 : i32
    %c0_i32_0 = arith.constant 0 : i32
    %c0_i32_1 = arith.constant 0 : i32
    return %c0_i32, %c0_i32_0 : i32, i32
  }
  func.func @transform_7(%arg0: i32) -> (i32, i32) {
    %c0_i32 = arith.constant 0 : i32
    %c0_i32_0 = arith.constant 0 : i32
    %c0_i32_1 = arith.constant 0 : i32
    return %c0_i32, %c0_i32_0 : i32, i32
  }
  func.func @transform_8(%arg0: i32) -> i32 {
    %c0_i32 = arith.constant 0 : i32
    %c0_i32_0 = arith.constant 0 : i32
    return %c0_i32 : i32
  }
  func.func @transform_9(%arg0: i32) -> (i32, i32) {
    %c0_i32 = arith.constant 0 : i32
    %c0_i32_0 = arith.constant 0 : i32
    return %c0_i32, %arg0 : i32, i32
  }
}

</mosaic_0001>

<bundles_post_ra>
// kernel: hate_speech_mlp_forward.1
= control target key start
LH: loop header
LB: loop body
LE: loop exit
PB: predicated region body
PF: predicated region fallthrough
CT: control target
= control target key end

     0   :  { %s2676_s0 = inlined_call_operand.hbm [shape: f32[300,384], index: 0, kind: input, shape index: {}]   ;;  %s2677_s1 = inlined_call_operand.hbm [shape: bf16[384,256], index: 1, kind: input, shape index: {}]   ;;  %s2678_s2 = inlined_call_operand.vmem [shape: f32[1,256], index: 2, kind: input, shape index: {}]   ;;  %s2679_s3 = inlined_call_operand.vmem [shape: f32[1,256], index: 3, kind: input, shape index: {}]   ;;  %s2680_s4 = inlined_call_operand.hbm [shape: bf16[256,128], index: 4, kind: input, shape index: {}]   ;;  %s2681_s5 = inlined_call_operand.vmem [shape: f32[1,128], index: 5, kind: input, shape index: {}]   ;;  %s2682_s6 = inlined_call_operand.vmem [shape: f32[1,128], index: 6, kind: input, shape index: {}]   ;;  %s2683_s7 = inlined_call_operand.vmem [shape: f32[1,128], index: 7, kind: input, shape index: {}]   ;;  %s2684_s8 = inlined_call_operand.<no memory space> [shape: f32[1], index: 8, kind: input, shape index: {}]   ;;  %s2685_s9 = inlined_call_operand.vmem [shape: f32[1,384], index: 9, kind: output, shape index: {}]  }
   0x1   :  { %14 = sst [smem:[#allocation2]] %s2684_s8 }
   0x2   :  { %15 = vsyncpa [#allocation4], 0 }
   0x3   :  { %17 = vsyncpa [#allocation4 + $0x1], 0 }
   0x4   :  { %18 = vsyncpa [#allocation6], 0  ;;  %s2181_s11 = smov 0   ;;  %s2183_s12 = smov 0  }
   0x5   :  { %s2185_s13 = smov 0   ;;  %s2187_s14 = smov 0  }
   0x6 LB: > { %s2200_s8 = sadd.s32 4294967295, %s2113_s14   ;;  %s2203_s15 = sadd.s32 1, %s2113_s14   ;;  %s2113_s14 = sphi %s2187_s14, %s2703_s14   ;;  %s2109_s13 = sphi %s2185_s13, %s2702_s13   ;;  %s2105_s12 = sphi %s2183_s12, %s2701_s12   ;;  %s2101_s11 = sphi %s2181_s11, %s2700_s11  }
   0x7   : > { %s28_s16 = ssub.s32 %s2113_s14, %s2203_s15  ;;  %s31_s17 = sadd.s32 1, %s2109_s13 }
   0x8   : > { %p29_p0 = scmp.eq.s32.totalorder %s28_s16, 0  ;;  %p38_p1 = scmp.ne.s32.totalorder %s2109_s13, %s2105_s12 }
   0x9   : > { %p39_p2 = scmp.eq.s32.totalorder %s2113_s14, 0  ;;  %p44_p3 = scmp.ne.s32.totalorder %s2105_s12, %s2101_s11 }
   0xa   : > { %s2213_s18 = scalar_select %p29_p0, %s2109_s13, %s31_s17  }
   0xb   : > { %p2215_p4 = por %p39_p2, %p38_p1  ;;  %p2686_p5 = scmp.eq.s32.totalorder %s2200_s8, 0 }
   0xc   : > { %2689 = sst [smem:[#allocation10_spill]] %s2213_s18  ;;  %p1562_p6 = scmp.ge.s32.totalorder %s2113_s14, 1 }
   0xd   : > { %s2690_s19 = scalar_select %p2215_p4, 1, 0 }
   0xe   : > { %p249_p7 = scmp.lt.s32.totalorder %s2113_s14, 4  ;;  %p2224_p8 = por %p2686_p5, %p44_p3 }
   0xf   : > { %s2115_s22 = smov [#allocation5]   ;;  %s2116_s25 = smov [#allocation7]  }
  0x10   : > { %s2691_s20 = scalar_select %p2224_p8, 1, 0 }
  0x11   : > { %p2228_p9 = pnand %p1562_p6, %p249_p7  ;;  %s261_s23 = sshll.u32 %s2115_s22, 4  ;;  %s262_s23 = int_to_ptr.vmem [resolvable:$true] %s261_s23 }
  0x12   : > { %s280_s26 = sshll.u32 %s2116_s25, 4  ;;  %s1991_s29 = scalar_lea.hbm %s2677_s1, 6144  ;;  %s2240_s26 = int_to_ptr.vmem [resolvable:$true] %s280_s26 }
  0x13   : > { %s2692_s21 = scalar_select %p2228_p9, 1, 0 }
  0x14   : > { %p1844_p10 = pneg %p2228_p9  ;;  %p1992_p12 = scmp.ne.s32.totalorder %s2677_s1, %s1991_s29 }
  0x15   : > { %p1998_p2 = scmp.lt.u32.totalorder %s1991_s29, %s2677_s1 }
  0x16   : > { %p2236_p11 = pnand %p1844_p10, %p2686_p5 }
  0x18   : > { %p1993_p13 = pneg %p2236_p11 }
  0x1a   : > { %p1994_p0 = pnand %p1993_p13, %p1992_p12 }
  0x1c   : > { %p1995_p1 = pneg %p1994_p0 }
  0x1e   : > { %p2000_p3 = pnand %p1998_p2, %p1995_p1 }
  0x20   : > { %2003 = shalt.err (!%p2000_p3)
}
  0x21   : > { %s2004_s17 = scalar_lea.vmem %s262_s23, 6144  ;;  %p2012_p5 = scmp.lt.s32.totalorder %s262_s23, %s262_s23 }
  0x22   : > { %p2005_p6 = scmp.ne.s32.totalorder %s262_s23, %s2004_s17  ;;  %p2013_p8 = scmp.lt.s32.totalorder %s2004_s17, %s2004_s17 }
  0x24   : > { %p2007_p7 = pnand %p2005_p6, %p1993_p13  ;;  %p2014_p9 = por %p2013_p8, %p2012_p5 }
  0x26   : > { %p2008_p10 = pneg %p2007_p7 }
  0x28   : > { %p2015_p4 = pnand %p2014_p9, %p2008_p10 }
  0x2a   : > { %2018 = shalt.err (!%p2015_p4)
}
  0x2b   : > { %s2117_s22 = smov 128   ;;  %s2118_s25 = smov 8  }
  0x2c   : > { %1847 = dma.hbm_to_vmem [thread:$0]  (!%p2236_p11), %s2677_s1, 6144, %s262_s23, [#allocation6], %s2117_s22, %s2117_s22, %s2118_s25  }
  0x2d   : > { %s2019_s10 = scalar_lea.hbm %s2680_s4, 2048 }
  0x2e   : > { %p2020_p12 = scmp.ne.s32.totalorder %s2680_s4, %s2019_s10  ;;  %p2026_p8 = scmp.lt.u32.totalorder %s2019_s10, %s2680_s4 }
  0x30   : > { %p2022_p4 = pnand %p2020_p12, %p1993_p13 }
  0x32   : > { %p2023_p5 = pneg %p2022_p4 }
  0x34   : > { %p2028_p9 = pnand %p2026_p8, %p2023_p5 }
  0x36   : > { %2031 = shalt.err (!%p2028_p9)
}
  0x37   : > { %s2032_s23 = scalar_lea.vmem %s2240_s26, 2048  ;;  %p2040_p3 = scmp.lt.s32.totalorder %s2240_s26, %s2240_s26 }
  0x38   : > { %p2033_p0 = scmp.ne.s32.totalorder %s2240_s26, %s2032_s23  ;;  %p2041_p6 = scmp.lt.s32.totalorder %s2032_s23, %s2032_s23 }
  0x3a   : > { %p2035_p1 = pnand %p2033_p0, %p1993_p13  ;;  %p2042_p7 = por %p2041_p6, %p2040_p3 }
  0x3c   : > { %p2036_p2 = pneg %p2035_p1 }
  0x3e   : > { %p2043_p10 = pnand %p2042_p7, %p2036_p2 }
  0x40   : > { %2046 = shalt.err (!%p2043_p10)
}
  0x41   : > { %s2119_s18 = smov 64   ;;  %s2120_s22 = smov 4  }
  0x42   : > { %1850 = dma.hbm_to_vmem [thread:$0]  (!%p2236_p11), %s2680_s4, 2048, %s2240_s26, [#allocation6], %s2119_s18, %s2119_s18, %s2120_s22  }
  0x43   : > { %p1565_p12 = scmp.ge.s32.totalorder %s2113_s14, 3 }
  0x44   : > { %p2694_p13 = scmp.ne.s32.totalorder (!%p1565_p12), %s2690_s19, 0 }
  0x45   : > { %302 = sbr.rel (%p1565_p12) target bundleno = 112 (0x70), region = 48 }
  0x4c   : > { %305 = sbr.rel (!%p2694_p13) target bundleno = 112 (0x70), region = 52  ;;  %s306_s28 = sand.u32 (%p2694_p13), 1, %s2109_s13  }
  0x4d   : > { %s1566_s29 = sshll.u32 (%p2694_p13), %s2113_s14, 4  ;;  %s1832_s30 = smul.u32 (%p2694_p13), 384, %s306_s28 }
  0x4e   : > { %s312_s10 = ssub.s32 (%p2694_p13), 38, %s1566_s29  ;;  %s2297_s16 = scalar_lea.sflag (%p2694_p13), [#allocation4], %s306_s28 }
  0x4f   : > { %p313_p4 = scmp.lt.s32.totalorder (%p2694_p13), %s312_s10, 16  ;;  %s310_s26 = scalar_lea.vmem (%p2694_p13), [#allocation3], %s1832_s30 }
  0x53   : > { %s2705_s10 = smov (!%p313_p4, %s312_s10), 16 }
  0x54   : > { %s2294_s11 = smul.u32 384, %s2705_s10 }
  0x56   : > { %s318_s24 = ssub.s32 6144, %s2294_s11 }
  0x57   : > { %319 = vsyncadd %s2297_s16, %s318_s24  ;;  %p1569_p11 = scmp.ne.s32.totalorder %s2294_s11, 0  ;;  %s1833_s19 = smul.u32 6144, %s2113_s14 }
  0x58   : > { %s325_s17 = sshll.u32 %s310_s26, 4  ;;  %s2051_s14 = scalar_lea.hbm %s2676_s0, 14592  ;;  %s2307_s17 = int_to_ptr.vmem [resolvable:$true] %s325_s17 }
  0x59   : > { %s2305_s22 = scalar_lea.hbm %s2676_s0, %s1833_s19 }
  0x5a   : > { %s2047_s25 = scalar_lea.hbm %s2305_s22, %s2294_s11  ;;  %p2052_p0 = scmp.lt.u32.totalorder %s2305_s22, %s2676_s0 }
  0x5b   : > { %p2048_p5 = scmp.ne.s32.totalorder %s2305_s22, %s2047_s25  ;;  %p2053_p1 = scmp.lt.u32.totalorder %s2051_s14, %s2047_s25 }
  0x5c   : > { %p2055_p3 = scmp.lt.u32.totalorder %s2047_s25, %s2305_s22 }
  0x5d   : > { %p2049_p8 = pnand %p2048_p5, %p1569_p11  ;;  %p2054_p2 = por %p2053_p1, %p2052_p0 }
  0x5f   : > { %p2050_p9 = pneg %p2049_p8  ;;  %p2056_p6 = por %p2055_p3, %p2054_p2 }
  0x61   : > { %p2057_p7 = pnand %p2056_p6, %p2050_p9 }
  0x63   : > { %2060 = shalt.err (!%p2057_p7)
}
  0x64   : > { %s2061_s10 = scalar_lea.vmem %s2307_s17, %s2294_s11  ;;  %s2121_s24 = smov [#allocation3]  }
  0x65   : > { %p2062_p10 = scmp.ne.s32.totalorder %s2307_s17, %s2061_s10  ;;  %s2065_s26 = sshll.u32 %s2121_s24, 4  ;;  %s2066_s26 = int_to_ptr.vmem [resolvable:$false] %s2065_s26 }
  0x66   : > { %s2067_s19 = scalar_lea.vmem %s2066_s26, 12288  ;;  %p2068_p4 = scmp.lt.s32.totalorder %s2307_s17, %s2066_s26 }
  0x67   : > { %p2063_p12 = pnand %p2062_p10, %p1569_p11  ;;  %p2069_p5 = scmp.lt.s32.totalorder %s2067_s19, %s2061_s10 }
  0x69   : > { %p2064_p13 = pneg %p2063_p12  ;;  %p2070_p8 = por %p2069_p5, %p2068_p4 }
  0x6b   : > { %p2071_p0 = pnand %p2070_p8, %p2064_p13 }
  0x6d   : > { %2074 = shalt.err (!%p2071_p0)
}
  0x6e   : > { %s2122_s23 = smov 384   ;;  %s2123_s18 = smov 24  }
  0x6f   : > { %331 = dma.hbm_to_vmem [thread:$0]  (%p1569_p11), %s2305_s22, %s2294_s11, %s2307_s17, %s2297_s16, %s2122_s23, %s2122_s23, %s2123_s18  }
  0x70 PF: > { %p2695_p9 = scmp.ne.s32.totalorder %s2692_s21, 0 }
  0x71   : > { %s339_s25 = sand.u32 (!%p2695_p9), 1, %s2105_s12   ;;  %p2696_p1 = scmp.ne.s32.totalorder (!%p2695_p9), %s2691_s20, 0 }
  0x72   : > { %337 = sbr.rel (%p2695_p9) target bundleno = 1009 (0x3f1), region = 56  ;;  %s340_s28 = scalar_lea.sflag (!%p2695_p9), [#allocation4], %s339_s25 }
  0x73   : > { %s1834_s27 = smul.u32 (!%p2695_p9), 384, %s339_s25 }
  0x75   : > { %s2337_s14 = scalar_lea.vmem (!%p2695_p9), [#allocation3], %s1834_s27 }
  0x79   : > { %2092 = dma.done.wait (%p2696_p1), %s340_s28, 6144  }
  0x7a   : > { %2094 = vsyncadd (%p2696_p1), %s340_s28, 4294961152  ;;  %p2697_p2 = scmp.eq.s32.totalorder %s2200_s8, 0 }
  0x7c   : > { %2096 = dma.done.wait (%p2697_p2), [#allocation6], 8192   ;;  %p2698_p11 = pmov %p2697_p2 }
  0x7d   : > { %v2124_v0 = vmov 0   ;;  %v1899_v1 = vld [vmem:[#allocation5 + $0x4] ss:$8 sps:$4 sm:$0xff]   ;;  %v1901_v2 = vld [vmem:[#allocation5] ss:$8 sps:$4 sm:$0xff]   ;;  %v417_v48 = vld [vmem:[%s2337_s14 + $0xb8] sm:$0xff] }
  0x7e   : > { %2098 = vsyncadd (%p2698_p11), [#allocation6], 4294959104  ;;  %929 = vmatprep.mubr.bf16.mxu1 %v2124_v0  ;;  %754 = vmatprep.subr.bf16.mxu0 %v1899_v1  ;;  %v1902_v3 = vld [vmem:[#allocation5 + $0x14] ss:$8 sps:$4 sm:$0xff]   ;;  %v1904_v4 = vld [vmem:[#allocation5 + $0x10] ss:$8 sps:$4 sm:$0xff]  }
  0x7f   : > { %755 = vmatpush1.bf16.msra.mxu0 %v1901_v2  ;;  %v1905_v5 = vld [vmem:[#allocation5 + $0x24] ss:$8 sps:$4 sm:$0xff]   ;;  %v1907_v6 = vld [vmem:[#allocation5 + $0x20] ss:$8 sps:$4 sm:$0xff]   ;;  %v1908_v7 = vld [vmem:[#allocation5 + $0x34] ss:$8 sps:$4 sm:$0xff]  }
  0x80   : > { %756 = vmatprep.subr.bf16.mxu0 %v1902_v3  ;;  %v1910_v8 = vld [vmem:[#allocation5 + $0x30] ss:$8 sps:$4 sm:$0xff]   ;;  %v1911_v9 = vld [vmem:[#allocation5 + $0x44] ss:$8 sps:$4 sm:$0xff]   ;;  %v1913_v10 = vld [vmem:[#allocation5 + $0x40] ss:$8 sps:$4 sm:$0xff]  }
  0x81   : > { %v1914_v11 = vld [vmem:[#allocation5 + $0x54] ss:$8 sps:$4 sm:$0xff]   ;;  %v1916_v12 = vld [vmem:[#allocation5 + $0x50] ss:$8 sps:$4 sm:$0xff]   ;;  %v1917_v13 = vld [vmem:[#allocation5 + $0x64] ss:$8 sps:$4 sm:$0xff]  }
  0x82   : > { %v2348_v14 = vld [vmem:[#allocation5 + $0x104] ss:$8 sps:$4 sm:$0xff]   ;;  %v2350_v15 = vld [vmem:[#allocation5 + $0x100] ss:$8 sps:$4 sm:$0xff]   ;;  %v2354_v17 = vld [vmem:[#allocation5 + $0x114] ss:$8 sps:$4 sm:$0xff]  }
  0x83   : > { %757 = vmatpush1.bf16.msra.mxu0 %v1904_v4  ;;  %1784 = vmatprep.subr.bf16.mxu1 %v2348_v14  ;;  %v1919_v16 = vld [vmem:[#allocation5 + $0x60] ss:$8 sps:$4 sm:$0xff]   ;;  %v2356_v18 = vld [vmem:[#allocation5 + $0x110] ss:$8 sps:$4 sm:$0xff]   ;;  %v1920_v19 = vld [vmem:[#allocation5 + $0x74] ss:$8 sps:$4 sm:$0xff]  }
  0x84   : > { %758 = vmatprep.subr.bf16.mxu0 %v1905_v5  ;;  %1792 = vmatpush1.bf16.msra.mxu1 %v2350_v15  ;;  %v395_v20 = vld [vmem:[%s2337_s14 + $0x8] sm:$0xff]  ;;  %v398_v21 = vld [vmem:[%s2337_s14 + $0x20] sm:$0xff]  ;;  %v1922_v24 = vld [vmem:[#allocation5 + $0x70] ss:$8 sps:$4 sm:$0xff]   ;;  %vm2126_vm0 = vmmov 0   ;;  %s1404_s26 = sld [smem:[#allocation2]] }
  0x85   : > { %1785 = vmatprep.subr.bf16.mxu1 %v2354_v17  ;;  %v443_v22 = vpack.c.bf16 %v398_v21, %v395_v20  ;;  %v2361_v23 = vld [vmem:[#allocation5 + $0x124] ss:$8 sps:$4 sm:$0xff]   ;;  %v2364_v25 = vld [vmem:[#allocation5 + $0x120] ss:$8 sps:$4 sm:$0xff]   ;;  %v2366_v27 = vld [vmem:[#allocation5 + $0x134] ss:$8 sps:$4 sm:$0xff]  }
  0x86   : > { %v1923_v26 = vld [vmem:[#allocation5 + $0x84] ss:$8 sps:$4 sm:$0xff]   ;;  %v1925_v28 = vld [vmem:[#allocation5 + $0x80] ss:$8 sps:$4 sm:$0xff]   ;;  %v2370_v29 = vld [vmem:[#allocation5 + $0x130] ss:$8 sps:$4 sm:$0xff]  }
  0x87   : > { %759 = vmatpush1.bf16.msra.mxu0 %v1907_v6  ;;  %786 = vmatprep.mubr.bf16.mxu0 %v443_v22  ;;  %v1926_v30 = vld [vmem:[#allocation5 + $0x94] ss:$8 sps:$4 sm:$0xff]   ;;  %v2373_v31 = vld [vmem:[#allocation5 + $0x144] ss:$8 sps:$4 sm:$0xff]   ;;  %v1928_v32 = vld [vmem:[#allocation5 + $0x90] ss:$8 sps:$4 sm:$0xff]  }
  0x88   : > { %760 = vmatprep.subr.bf16.mxu0 %v1908_v7  ;;  %1793 = vmatpush1.bf16.msra.mxu1 %v2356_v18  ;;  %v2376_v33 = vld [vmem:[#allocation5 + $0x140] ss:$8 sps:$4 sm:$0xff]   ;;  %v1929_v34 = vld [vmem:[#allocation5 + $0xa4] ss:$8 sps:$4 sm:$0xff]   ;;  %v2379_v35 = vld [vmem:[#allocation5 + $0x154] ss:$8 sps:$4 sm:$0xff]  }
  0x89   : > { %1786 = vmatprep.subr.bf16.mxu1 %v2361_v23  ;;  %v1931_v36 = vld [vmem:[#allocation5 + $0xa0] ss:$8 sps:$4 sm:$0xff]   ;;  %v2382_v37 = vld [vmem:[#allocation5 + $0x150] ss:$8 sps:$4 sm:$0xff]   ;;  %v1932_v38 = vld [vmem:[#allocation5 + $0xb4] ss:$8 sps:$4 sm:$0xff]  }
  0x8a   : > { %v2385_v39 = vld [vmem:[#allocation5 + $0x164] ss:$8 sps:$4 sm:$0xff]   ;;  %v1934_v40 = vld [vmem:[#allocation5 + $0xb0] ss:$8 sps:$4 sm:$0xff]   ;;  %v2388_v41 = vld [vmem:[#allocation5 + $0x160] ss:$8 sps:$4 sm:$0xff]  }
  0x8b   : > { %761 = vmatpush1.bf16.msra.mxu0 %v1910_v8  ;;  %v1935_v42 = vld [vmem:[#allocation5 + $0xc4] ss:$8 sps:$4 sm:$0xff]   ;;  %v2391_v43 = vld [vmem:[#allocation5 + $0x174] ss:$8 sps:$4 sm:$0xff]   ;;  %v1937_v44 = vld [vmem:[#allocation5 + $0xc0] ss:$8 sps:$4 sm:$0xff]  }
  0x8c   : > { %762 = vmatprep.subr.bf16.mxu0 %v1911_v9  ;;  %1794 = vmatpush1.bf16.msra.mxu1 %v2364_v25  ;;  %v1938_v45 = vld [vmem:[#allocation5 + $0xd4] ss:$8 sps:$4 sm:$0xff]   ;;  %v2394_v46 = vld [vmem:[#allocation5 + $0x170] ss:$8 sps:$4 sm:$0xff]   ;;  %v414_v47 = vld [vmem:[%s2337_s14 + $0xa0] sm:$0xff]  ;;  %p390_p3 = scmp.lt.s32.totalorder %s2200_s8, 2 }
  0x8d   : > { %1787 = vmatprep.subr.bf16.mxu1 %v2366_v27  ;;  %v1940_v49 = vld [vmem:[#allocation5 + $0xd0] ss:$8 sps:$4 sm:$0xff]   ;;  %v1941_v50 = vld [vmem:[#allocation5 + $0xe4] ss:$8 sps:$4 sm:$0xff]   ;;  %v453_v51 = vpack.c.bf16 %v417_v48, %v414_v47  ;;  %v1945_v52 = vld [vmem:[#allocation5 + $0xe0] ss:$8 sps:$4 sm:$0xff]  }
  0x8e   : > { %v420_v53 = vld [vmem:[%s2337_s14 + $0xd0] sm:$0xff]  ;;  %v423_v54 = vld [vmem:[%s2337_s14 + $0xe8] sm:$0xff]  ;;  %v394_v58 = vld [vmem:[%s2337_s14] sm:$0xff]  ;;  %s2707_s8 = smov (!%p390_p3, %s2200_s8), 2 }
  0x8f   : > { %763 = vmatpush1.bf16.msra.mxu0 %v1913_v10  ;;  %v1947_v55 = vld [vmem:[#allocation5 + $0xf4] ss:$8 sps:$4 sm:$0xff]   ;;  %v456_v56 = vpack.c.bf16 %v423_v54, %v420_v53  ;;  %v1951_v57 = vld [vmem:[#allocation5 + $0xf0] ss:$8 sps:$4 sm:$0xff]   ;;  %v426_v1 = vld [vmem:[%s2337_s14 + $0x100] sm:$0xff]  ;;  %s392_s18 = scalar_lea.vmem %s2685_s9, %s2707_s8 }
  0x90   : > { %764 = vmatprep.subr.bf16.mxu0 %v1914_v11  ;;  %1795 = vmatpush1.bf16.msra.mxu1 %v2370_v29  ;;  %v397_v59 = vld [vmem:[%s2337_s14 + $0x18] sm:$0xff]  ;;  %v404_v61 = vld [vmem:[%s2337_s14 + $0x50] sm:$0xff]  ;;  %v403_v5 = vld [vmem:[%s2337_s14 + $0x48] sm:$0xff] }
  0x91   : > { %1788 = vmatprep.subr.bf16.mxu1 %v2373_v31  ;;  %v401_v60 = vld [vmem:[%s2337_s14 + $0x38] sm:$0xff]  ;;  %v442_v62 = vpack.c.bf16 %v397_v59, %v394_v58  ;;  %v400_v4 = vld [vmem:[%s2337_s14 + $0x30] sm:$0xff]  ;;  %v407_v6 = vld [vmem:[%s2337_s14 + $0x68] sm:$0xff] }
  0x92   : > { %v446_v63 = vpack.c.bf16 %v404_v61, %v401_v60  ;;  %v429_v2 = vld [vmem:[%s2337_s14 + $0x118] sm:$0xff]  ;;  %v410_v7 = vld [vmem:[%s2337_s14 + $0x80] sm:$0xff]  ;;  %v445_v8 = vpack.c.bf16 %v403_v5, %v400_v4  ;;  %v432_v10 = vld [vmem:[%s2337_s14 + $0x130] sm:$0xff] }
  0x93   : > { %765 = vmatpush1.bf16.msra.mxu0 %v1916_v12  ;;  %v459_v3 = vpack.c.bf16 %v429_v2, %v426_v1  ;;  %v449_v9 = vpack.c.bf16 %v410_v7, %v407_v6  ;;  %v435_v11 = vld [vmem:[%s2337_s14 + $0x148] sm:$0xff]  ;;  %v441_v20 = vld [vmem:[%s2337_s14 + $0x178] sm:$0xff]  ;;  %v412_v22 = vld [vmem:[%s2337_s14 + $0x90] sm:$0xff] }
  0x94   : > { %766 = vmatprep.subr.bf16.mxu0 %v1917_v13  ;;  %1796 = vmatpush1.bf16.msra.mxu1 %v2376_v33  ;;  %v462_v12 = vpack.c.bf16 %v435_v11, %v432_v10  ;;  %v406_v13 = vld [vmem:[%s2337_s14 + $0x60] sm:$0xff]  ;;  %v439_v47 = vld [vmem:[%s2337_s14 + $0x168] sm:$0xff]  ;;  %v405_v53 = vld [vmem:[%s2337_s14 + $0x58] sm:$0xff] }
  0x95   : > { %1789 = vmatprep.subr.bf16.mxu1 %v2379_v35  ;;  %v1971_v58 = vld [vmem:[#allocation7 + $0x40] sm:$0xff]   ;;  %v1973_v60 = vld [vmem:[#allocation7 + $0x48] sm:$0xff]   ;;  %v1977_v1 = vld [vmem:[#allocation7 + $0x58] sm:$0xff]  }
  0x96   : > { %v1972_v59 = vld [vmem:[#allocation7] sm:$0xff]   ;;  %v1974_v61 = vld [vmem:[#allocation7 + $0x8] sm:$0xff]   ;;  %v1978_v2 = vld [vmem:[#allocation7 + $0x18] sm:$0xff]  }
  0x97   : > { %767 = vmatpush1.bf16.msra.mxu0 %v1919_v16  ;;  %v416_v16 = vld [vmem:[%s2337_s14 + $0xb0] sm:$0xff]  ;;  %v1981_v4 = vld [vmem:[#allocation7 + $0x68] sm:$0xff]  }
  0x98   : > { %768 = vmatprep.subr.bf16.mxu0 %v1920_v19  ;;  %1797 = vmatpush1.bf16.msra.mxu1 %v2382_v37  ;;  %v438_v19 = vld [vmem:[%s2337_s14 + $0x160] sm:$0xff]  ;;  %v1982_v5 = vld [vmem:[#allocation7 + $0x28] sm:$0xff]   ;;  %v1983_v6 = vld [vmem:[#allocation7 + $0x70] sm:$0xff]  }
  0x99   : > { %1790 = vmatprep.subr.bf16.mxu1 %v2385_v39  ;;  %v465_v21 = vpack.c.bf16 %v441_v20, %v438_v19  ;;  %v1984_v7 = vld [vmem:[#allocation7 + $0x30] sm:$0xff]  }
  0x9b   : > { %769 = vmatpush1.bf16.msra.mxu0 %v1922_v24  ;;  %v419_v24 = vld [vmem:[%s2337_s14 + $0xc8] sm:$0xff] }
  0x9c   : > { %770 = vmatprep.subr.bf16.mxu0 %v1923_v26  ;;  %1798 = vmatpush1.bf16.msra.mxu1 %v2388_v41 }
  0x9d   : > { %1791 = vmatprep.subr.bf16.mxu1 %v2391_v43 }
  0x9f   : > { %771 = vmatpush1.bf16.msra.mxu0 %v1925_v28  ;;  %v418_v28 = vld [vmem:[%s2337_s14 + $0xc0] sm:$0xff] }
  0xa0   : > { %772 = vmatprep.subr.bf16.mxu0 %v1926_v30  ;;  %1799 = vmatpush1.bf16.msra.mxu1 %v2394_v46  ;;  %v425_v30 = vld [vmem:[%s2337_s14 + $0xf8] sm:$0xff] }
  0xa1   : > { %1644 = vmatprep.subr.bf16.mxu1 %v1971_v58 }
  0xa3   : > { %773 = vmatpush1.bf16.msra.mxu0 %v1928_v32  ;;  %930 = vmatmul.mubr.bf16.vlgmr.msra.gmra.mrb[0].mxu1 %v453_v51 }
  0xa4   : > { %774 = vmatprep.subr.bf16.mxu0 %v1929_v34  ;;  %939 = vmatprep.mubr.bf16.mxu1 %v2124_v0  ;;  %v424_v34 = vld [vmem:[%s2337_s14 + $0xf0] sm:$0xff] }
  0xa5   : > { %1645 = vmatpush3.bf16.msra.mxu1 %v1972_v59 }
  0xa6   : > { %1646 = vmatprep.subr.bf16.mxu1 %v1973_v60 }
  0xa7   : > { %775 = vmatpush1.bf16.msra.mxu0 %v1931_v36  ;;  %v431_v36 = vld [vmem:[%s2337_s14 + $0x128] sm:$0xff] }
  0xa8   : > { %776 = vmatprep.subr.bf16.mxu0 %v1932_v38 }
  0xa9   : > { %1647 = vmatpush3.bf16.msra.mxu1 %v1974_v61 }
  0xab   : > { %777 = vmatpush1.bf16.msra.mxu0 %v1934_v40  ;;  %940 = vmatmul.mubr.bf16.gmra.mrb[4].mxu1 %v456_v56  ;;  %v430_v40 = vld [vmem:[%s2337_s14 + $0x120] sm:$0xff]  ;;  %v411_v56 = vld [vmem:[%s2337_s14 + $0x88] sm:$0xff] }
  0xac   : > { %778 = vmatprep.subr.bf16.mxu0 %v1935_v42  ;;  %949 = vmatprep.mubr.bf16.mxu1 %v2124_v0  ;;  %v437_v42 = vld [vmem:[%s2337_s14 + $0x158] sm:$0xff] }
  0xaf   : > { %779 = vmatpush1.bf16.msra.mxu0 %v1937_v44 }
  0xb0   : > { %780 = vmatprep.subr.bf16.mxu0 %v1938_v45 }
  0xb3   : > { %781 = vmatpush1.bf16.msra.mxu0 %v1940_v49  ;;  %950 = vmatmul.mubr.bf16.gmra.mrb[8].mxu1 %v459_v3  ;;  %v396_v49 = vld [vmem:[%s2337_s14 + $0x10] sm:$0xff]  ;;  %v1980_v3 = vld [vmem:[#allocation7 + $0x20] sm:$0xff]  }
  0xb4   : > { %782 = vmatprep.subr.bf16.mxu0 %v1941_v50  ;;  %959 = vmatprep.mubr.bf16.mxu1 %v2124_v0  ;;  %v399_v50 = vld [vmem:[%s2337_s14 + $0x28] sm:$0xff] }
  0xb5   : > { %v444_v51 = vpack.c.bf16 %v399_v50, %v396_v49 }
  0xb7   : > { %783 = vmatpush1.bf16.msra.mxu0 %v1945_v52  ;;  %v402_v52 = vld [vmem:[%s2337_s14 + $0x40] sm:$0xff] }
  0xb8   : > { %784 = vmatprep.subr.bf16.mxu0 %v1947_v55  ;;  %v447_v54 = vpack.c.bf16 %v405_v53, %v402_v52  ;;  %v408_v55 = vld [vmem:[%s2337_s14 + $0x70] sm:$0xff] }
  0xbb   : > { %785 = vmatpush1.bf16.msra.mxu0 %v1951_v57  ;;  %960 = vmatmul.mubr.bf16.gmra.mrb[12].mxu1 %v462_v12  ;;  %v450_v57 = vpack.c.bf16 %v411_v56, %v408_v55 }
  0xbc   : > { %867 = vmatprep.subr.bf16.mxu0 %v2348_v14  ;;  %v409_v14 = vld [vmem:[%s2337_s14 + $0x78] sm:$0xff]  ;;  %969 = vmatprep.mubr.bf16.mxu1 %v2124_v0 }
  0xbe   : > { %787 = vmatmul.mubr.bf16.vlgmr.msra.gmra.mrb[0].mxu0 %v442_v62  ;;  %v1975_v62 = vld [vmem:[#allocation7 + $0x50] sm:$0xff]  }
  0xbf   : > { %868 = vmatpush1.bf16.msra.mxu0 %v2350_v15  ;;  %796 = vmatprep.mubr.bf16.mxu0 %v446_v63  ;;  %v413_v15 = vld [vmem:[%s2337_s14 + $0x98] sm:$0xff]  ;;  %v1976_v63 = vld [vmem:[#allocation7 + $0x10] sm:$0xff]  }
  0xc0   : > { %869 = vmatprep.subr.bf16.mxu0 %v2354_v17  ;;  %v448_v17 = vpack.c.bf16 %v409_v14, %v406_v13  ;;  %1648 = vmatprep.subr.bf16.mxu1 %v1975_v62 }
  0xc1   : > { %1649 = vmatpush3.bf16.msra.mxu1 %v1976_v63 }
  0xc2   : > { %1650 = vmatprep.subr.bf16.mxu1 %v1977_v1 }
  0xc3   : > { %870 = vmatpush1.bf16.msra.mxu0 %v2356_v18  ;;  %v452_v18 = vpack.c.bf16 %v416_v16, %v413_v15  ;;  %970 = vmatmul.mubr.bf16.gmra.mrb[16].mxu1 %v465_v21 }
  0xc4   : > { %871 = vmatprep.subr.bf16.mxu0 %v2361_v23  ;;  %v415_v23 = vld [vmem:[%s2337_s14 + $0xa8] sm:$0xff] }
  0xc5   : > { %v451_v26 = vpack.c.bf16 %v415_v23, %v412_v22  ;;  %1651 = vmatpush3.bf16.msra.mxu1 %v1978_v2  ;;  %v982_v22 = vlaneseq }
  0xc6   : > { %797 = vmatmul.mubr.bf16.gmra.mrb[4].mxu0 %v445_v8  ;;  %v1985_v8 = vld [vmem:[#allocation7 + $0x78] sm:$0xff]  }
  0xc7   : > { %806 = vmatprep.mubr.bf16.mxu0 %v449_v9  ;;  %872 = vmatpush1.bf16.msra.mxu0 %v2364_v25  ;;  %v422_v25 = vld [vmem:[%s2337_s14 + $0xe0] sm:$0xff]  ;;  %v1986_v9 = vld [vmem:[#allocation7 + $0x38] sm:$0xff]  }
  0xc8   : > { %873 = vmatprep.subr.bf16.mxu0 %v2366_v27  ;;  %v455_v27 = vpack.c.bf16 %v422_v25, %v419_v24 }
  0xcb   : > { %874 = vmatpush1.bf16.msra.mxu0 %v2370_v29  ;;  %v421_v29 = vld [vmem:[%s2337_s14 + $0xd8] sm:$0xff] }
  0xcc   : > { %875 = vmatprep.subr.bf16.mxu0 %v2373_v31  ;;  %v428_v31 = vld [vmem:[%s2337_s14 + $0x110] sm:$0xff]  ;;  %v454_v32 = vpack.c.bf16 %v421_v29, %v418_v28  ;;  %v980_v29 = vld [vmem:[%s2678_s2] sm:$0x3] }
  0xce   : > { %807 = vmatmul.mubr.bf16.gmra.mrb[8].mxu0 %v448_v17 }
  0xcf   : > { %816 = vmatprep.mubr.bf16.mxu0 %v452_v18  ;;  %876 = vmatpush1.bf16.msra.mxu0 %v2376_v33  ;;  %v458_v33 = vpack.c.bf16 %v428_v31, %v425_v30 }
  0xd0   : > { %877 = vmatprep.subr.bf16.mxu0 %v2379_v35  ;;  %v427_v35 = vld [vmem:[%s2337_s14 + $0x108] sm:$0xff] }
  0xd1   : > { %v457_v38 = vpack.c.bf16 %v427_v35, %v424_v34 }
  0xd3   : > { %878 = vmatpush1.bf16.msra.mxu0 %v2382_v37  ;;  %v434_v37 = vld [vmem:[%s2337_s14 + $0x140] sm:$0xff] }
  0xd4   : > { %879 = vmatprep.subr.bf16.mxu0 %v2385_v39  ;;  %v461_v39 = vpack.c.bf16 %v434_v37, %v431_v36 }
  0xd6   : > { %817 = vmatmul.mubr.bf16.gmra.mrb[12].mxu0 %v451_v26  ;;  %v983_v26 = vshrl.u32 %v982_v22, 7 }
  0xd7   : > { %826 = vmatprep.mubr.bf16.mxu0 %v455_v27  ;;  %880 = vmatpush1.bf16.msra.mxu0 %v2388_v41  ;;  %v433_v41 = vld [vmem:[%s2337_s14 + $0x138] sm:$0xff] }
  0xd8   : > { %881 = vmatprep.subr.bf16.mxu0 %v2391_v43  ;;  %v440_v43 = vld [vmem:[%s2337_s14 + $0x170] sm:$0xff]  ;;  %v460_v44 = vpack.c.bf16 %v433_v41, %v430_v40  ;;  %v984_v28 = vsub.s32 0, %v983_v26  ;;  %v988_v30 = vsub.s32 1, %v983_v26 }
  0xd9   : > { %v464_v45 = vpack.c.bf16 %v440_v43, %v437_v42 }
  0xda   : > { %v2495_v35 = vrot.slane %v980_v29, %v984_v28 }
  0xdb   : > { %882 = vmatpush1.bf16.msra.mxu0 %v2394_v46  ;;  %v436_v46 = vld [vmem:[%s2337_s14 + $0x150] sm:$0xff] }
  0xdc   : > { %v463_v48 = vpack.c.bf16 %v439_v47, %v436_v46 }
  0xde   : > { %827 = vmatmul.mubr.bf16.gmra.mrb[16].mxu0 %v454_v32 }
  0xdf   : > { %836 = vmatprep.mubr.bf16.mxu0 %v458_v33  ;;  %v1024_v33 = vld [vmem:[%s2679_s3] sm:$0x3] }
  0xe0   : > { %v2501_v40 = vrot.slane %v1024_v33, %v984_v28  ;;  %v2503_v43 = vrot.slane %v1024_v33, %v988_v30 }
  0xe6   : > { %837 = vmatmul.mubr.bf16.gmra.mrb[20].mxu0 %v457_v38  ;;  %v2499_v38 = vrot.slane %v980_v29, %v988_v30 }
  0xe7   : > { %846 = vmatprep.mubr.bf16.mxu0 %v461_v39 }
  0xee   : > { %847 = vmatmul.mubr.bf16.gmra.mrb[24].mxu0 %v460_v44 }
  0xef   : > { %856 = vmatprep.mubr.bf16.mxu0 %v464_v45 }
  0xf6   : > { %857 = vmatmul.mubr.bf16.gmra.mrb[28].mxu0 %v463_v48 }
  0xf7   : > { %899 = vmatprep.mubr.bf16.mxu0 %v2124_v0 }
  0xfe   : > { %900 = vmatmul.mubr.bf16.vlgmr.msra.gmra.mrb[0].mxu0 %v444_v51 }
  0xff   : > { %909 = vmatprep.mubr.bf16.mxu0 %v2124_v0 }
 0x106   : > { %910 = vmatmul.mubr.bf16.gmra.mrb[4].mxu0 %v447_v54 }
 0x107   : > { %919 = vmatprep.mubr.bf16.mxu0 %v2124_v0  ;;  %v1979_v0 = vld [vmem:[#allocation7 + $0x60] sm:$0xff]  }
 0x108   : > { %1652 = vmatprep.subr.bf16.mxu1 %v1979_v0 }
 0x109   : > { %1653 = vmatpush3.bf16.msra.mxu1 %v1980_v3 }
 0x10a   : > { %1654 = vmatprep.subr.bf16.mxu1 %v1981_v4 }
 0x10d   : > { %1655 = vmatpush3.bf16.msra.mxu1 %v1982_v5 }
 0x10e   : > { %920 = vmatmul.mubr.bf16.gmra.mrb[8].mxu0 %v450_v57  ;;  %1656 = vmatprep.subr.bf16.mxu1 %v1983_v6 }
 0x111   : > { %1657 = vmatpush3.bf16.msra.mxu1 %v1984_v7 }
 0x112   : > { %1658 = vmatprep.subr.bf16.mxu1 %v1985_v8 }
 0x115   : > { %1659 = vmatpush3.bf16.msra.mxu1 %v1986_v9 }
 0x176   : > { %v931_v10 = vpop.f32.mrb[0].mxu1 }
 0x177   : > { %v933_v11 = vpop.f32.mrb[1].mxu1 }
 0x178   : > { %v935_v12 = vpop.f32.mrb[2].mxu1 }
 0x179   : > { %v937_v13 = vpop.f32.mrb[3].mxu1 }
 0x17e   : > { %v941_v14 = vpop.f32.mrb[4].mxu1 }
 0x17f   : > { %v943_v15 = vpop.f32.mrb[5].mxu1 }
 0x180   : > { %v945_v16 = vpop.f32.mrb[6].mxu1 }
 0x181   : > { %v947_v17 = vpop.f32.mrb[7].mxu1 }
 0x186   : > { %v2467_v18 = vpop.f32.mrb[8].mxu1 }
 0x187   : > { %v2469_v19 = vpop.f32.mrb[9].mxu1 }
 0x188   : > { %v2471_v20 = vpop.f32.mrb[10].mxu1 }
 0x189   : > { %v2473_v21 = vpop.f32.mrb[11].mxu1 }
 0x18e   : > { %v2475_v23 = vpop.f32.mrb[12].mxu1 }
 0x18f   : > { %v2477_v24 = vpop.f32.mrb[13].mxu1 }
 0x190   : > { %v2479_v25 = vpop.f32.mrb[14].mxu1 }
 0x191   : > { %v2481_v27 = vpop.f32.mrb[15].mxu1 }
 0x196   : > { %v2486_v31 = vpop.f32.mrb[16].mxu1 }
 0x197   : > { %v2488_v32 = vpop.f32.mrb[17].mxu1 }
 0x198   : > { %v2493_v34 = vpop.f32.mrb[18].mxu1 }
 0x199   : > { %v2497_v36 = vpop.f32.mrb[19].mxu1 }
 0x1a9   : > { %v818_v37 = vpop.f32.mrb[12].mxu0 }
 0x1aa   : > { %v932_v39 = vadd.f32 %v931_v10, %v818_v37  ;;  %v820_v41 = vpop.f32.mrb[13].mxu0 }
 0x1ab   : > { %v934_v42 = vadd.f32 %v933_v11, %v820_v41  ;;  %v822_v44 = vpop.f32.mrb[14].mxu0 }
 0x1ac   : > { %v1004_v45 = vmul.f32 %v2495_v35, %v932_v39  ;;  %v936_v46 = vadd.f32 %v935_v12, %v822_v44  ;;  %v824_v47 = vpop.f32.mrb[15].mxu0 }
 0x1ad   : > { %v1005_v48 = vmul.f32 %v2499_v38, %v934_v42  ;;  %v938_v49 = vadd.f32 %v937_v13, %v824_v47 }
 0x1ae   : > { %v1048_v50 = vadd.f32 %v2501_v40, %v1004_v45  ;;  %v1006_v51 = vmul.f32 %v2495_v35, %v936_v46 }
 0x1af   : > { %v1049_v52 = vadd.f32 %v2503_v43, %v1005_v48  ;;  %v1007_v53 = vmul.f32 %v2499_v38, %v938_v49 }
 0x1b0   : > { %v1050_v54 = vadd.f32 %v2501_v40, %v1006_v51  ;;  %v1080_v57 = vmax.f32 %v1048_v50, 0.0 }
 0x1b1   : > { %v1051_v55 = vadd.f32 %v2503_v43, %v1007_v53  ;;  %v828_v56 = vpop.f32.mrb[16].mxu0  ;;  %v1081_v61 = vmax.f32 %v1049_v52, 0.0 }
 0x1b2   : > { %v1082_v58 = vmax.f32 %v1050_v54, 0.0  ;;  %v942_v59 = vadd.f32 %v941_v14, %v828_v56  ;;  %v830_v60 = vpop.f32.mrb[17].mxu0 }
 0x1b3   : > { %v1083_v62 = vmax.f32 %v1051_v55, 0.0  ;;  %v944_v63 = vadd.f32 %v943_v15, %v830_v60  ;;  %v832_v1 = vpop.f32.mrb[18].mxu0 }
 0x1b4   : > { %v1008_v2 = vmul.f32 %v2495_v35, %v942_v59  ;;  %v946_v0 = vadd.f32 %v945_v16, %v832_v1  ;;  %v834_v3 = vpop.f32.mrb[19].mxu0  ;;  %v2514_v4 = vpack.c.bf16 %v1082_v58, %v1080_v57 }
 0x1b5   : > { %v1009_v5 = vmul.f32 %v2499_v38, %v944_v63  ;;  %v948_v6 = vadd.f32 %v947_v17, %v834_v3  ;;  %v2517_v7 = vpack.c.bf16 %v1083_v62, %v1081_v61 }
 0x1b6   : > { %v1052_v8 = vadd.f32 %v2501_v40, %v1008_v2  ;;  %v1010_v9 = vmul.f32 %v2495_v35, %v946_v0 }
 0x1b7   : > { %v1053_v10 = vadd.f32 %v2503_v43, %v1009_v5  ;;  %v1011_v11 = vmul.f32 %v2499_v38, %v948_v6 }
 0x1b8   : > { %v1054_v12 = vadd.f32 %v2501_v40, %v1010_v9  ;;  %v1084_v15 = vmax.f32 %v1052_v8, 0.0 }
 0x1b9   : > { %v1055_v13 = vadd.f32 %v2503_v43, %v1011_v11  ;;  %v838_v14 = vpop.f32.mrb[20].mxu0  ;;  %v1085_v26 = vmax.f32 %v1053_v10, 0.0 }
 0x1ba   : > { %v1086_v16 = vmax.f32 %v1054_v12, 0.0  ;;  %v952_v22 = vadd.f32 %v2467_v18, %v838_v14  ;;  %v840_v17 = vpop.f32.mrb[21].mxu0 }
 0x1bb   : > { %v1087_v28 = vmax.f32 %v1055_v13, 0.0  ;;  %v954_v29 = vadd.f32 %v2469_v19, %v840_v17  ;;  %v842_v30 = vpop.f32.mrb[22].mxu0 }
 0x1bc   : > { %v1012_v33 = vmul.f32 %v2495_v35, %v952_v22  ;;  %v956_v37 = vadd.f32 %v2471_v20, %v842_v30  ;;  %v844_v39 = vpop.f32.mrb[23].mxu0  ;;  %v2529_v41 = vpack.c.bf16 %v1086_v16, %v1084_v15 }
 0x1bd   : > { %v1013_v42 = vmul.f32 %v2499_v38, %v954_v29  ;;  %v958_v44 = vadd.f32 %v2473_v21, %v844_v39  ;;  %v2533_v45 = vpack.c.bf16 %v1087_v28, %v1085_v26 }
 0x1be   : > { %v1056_v18 = vadd.f32 %v2501_v40, %v1012_v33  ;;  %v1014_v46 = vmul.f32 %v2495_v35, %v956_v37 }
 0x1bf   : > { %v1057_v19 = vadd.f32 %v2503_v43, %v1013_v42  ;;  %v1015_v47 = vmul.f32 %v2499_v38, %v958_v44 }
 0x1c0   : > { %v1058_v48 = vadd.f32 %v2501_v40, %v1014_v46  ;;  %v1088_v50 = vmax.f32 %v1056_v18, 0.0 }
 0x1c1   : > { %v1059_v20 = vadd.f32 %v2503_v43, %v1015_v47  ;;  %v848_v49 = vpop.f32.mrb[24].mxu0  ;;  %v1089_v53 = vmax.f32 %v1057_v19, 0.0 }
 0x1c2   : > { %v1090_v51 = vmax.f32 %v1058_v48, 0.0  ;;  %v962_v52 = vadd.f32 %v2475_v23, %v848_v49  ;;  %v850_v21 = vpop.f32.mrb[25].mxu0 }
 0x1c3   : > { %v1091_v54 = vmax.f32 %v1059_v20, 0.0  ;;  %v964_v55 = vadd.f32 %v2477_v24, %v850_v21  ;;  %v852_v56 = vpop.f32.mrb[26].mxu0 }
 0x1c4   : > { %v1016_v57 = vmul.f32 %v2495_v35, %v962_v52  ;;  %v966_v58 = vadd.f32 %v2479_v25, %v852_v56  ;;  %v854_v59 = vpop.f32.mrb[27].mxu0  ;;  %v2545_v60 = vpack.c.bf16 %v1090_v51, %v1088_v50 }
 0x1c5   : > { %v1017_v61 = vmul.f32 %v2499_v38, %v964_v55  ;;  %v968_v62 = vadd.f32 %v2481_v27, %v854_v59  ;;  %v2549_v63 = vpack.c.bf16 %v1091_v54, %v1089_v53 }
 0x1c6   : > { %v1060_v23 = vadd.f32 %v2501_v40, %v1016_v57  ;;  %v1018_v1 = vmul.f32 %v2495_v35, %v966_v58 }
 0x1c7   : > { %v1061_v24 = vadd.f32 %v2503_v43, %v1017_v61  ;;  %v1019_v2 = vmul.f32 %v2499_v38, %v968_v62 }
 0x1c8   : > { %v1062_v0 = vadd.f32 %v2501_v40, %v1018_v1  ;;  %v1092_v5 = vmax.f32 %v1060_v23, 0.0 }
 0x1c9   : > { %v1063_v25 = vadd.f32 %v2503_v43, %v1019_v2  ;;  %v858_v3 = vpop.f32.mrb[28].mxu0  ;;  %v1093_v9 = vmax.f32 %v1061_v24, 0.0 }
 0x1ca   : > { %v1094_v6 = vmax.f32 %v1062_v0, 0.0  ;;  %v972_v8 = vadd.f32 %v2486_v31, %v858_v3  ;;  %v860_v27 = vpop.f32.mrb[29].mxu0 }
 0x1cb   : > { %v1095_v10 = vmax.f32 %v1063_v25, 0.0  ;;  %v974_v11 = vadd.f32 %v2488_v32, %v860_v27  ;;  %v862_v12 = vpop.f32.mrb[30].mxu0 }
 0x1cc   : > { %v1020_v13 = vmul.f32 %v2495_v35, %v972_v8  ;;  %v976_v14 = vadd.f32 %v2493_v34, %v862_v12  ;;  %v864_v15 = vpop.f32.mrb[31].mxu0  ;;  %v2561_v16 = vpack.c.bf16 %v1094_v6, %v1092_v5 }
 0x1cd   : > { %v1021_v22 = vmul.f32 %v2499_v38, %v974_v11  ;;  %v978_v17 = vadd.f32 %v2497_v36, %v864_v15  ;;  %v2565_v26 = vpack.c.bf16 %v1095_v10, %v1093_v9 }
 0x1ce   : > { %v1064_v31 = vadd.f32 %v2501_v40, %v1020_v13  ;;  %v1022_v28 = vmul.f32 %v2495_v35, %v976_v14 }
 0x1cf   : > { %v1065_v32 = vadd.f32 %v2503_v43, %v1021_v22  ;;  %v1023_v29 = vmul.f32 %v2499_v38, %v978_v17 }
 0x1d0   : > { %v1066_v30 = vadd.f32 %v2501_v40, %v1022_v28  ;;  %v1096_v37 = vmax.f32 %v1064_v31, 0.0 }
 0x1d1   : > { %v1067_v34 = vadd.f32 %v2503_v43, %v1023_v29  ;;  %v901_v33 = vpop.f32.mrb[0].mxu0  ;;  %v1097_v44 = vmax.f32 %v1065_v32, 0.0 }
 0x1d2   : > { %v1098_v39 = vmax.f32 %v1066_v30, 0.0  ;;  %v992_v42 = vmul.f32 %v2495_v35, %v901_v33  ;;  %v903_v36 = vpop.f32.mrb[1].mxu0 }
 0x1d3   : > { %v1099_v18 = vmax.f32 %v1067_v34, 0.0  ;;  %v993_v46 = vmul.f32 %v2499_v38, %v903_v36  ;;  %v905_v19 = vpop.f32.mrb[2].mxu0 }
 0x1d4   : > { %v1036_v47 = vadd.f32 %v2501_v40, %v992_v42  ;;  %v994_v48 = vmul.f32 %v2495_v35, %v905_v19  ;;  %v907_v20 = vpop.f32.mrb[3].mxu0  ;;  %v1114_v49 = vpack.c.bf16 %v1098_v39, %v1096_v37 }
 0x1d5   : > { %v1037_v50 = vadd.f32 %v2503_v43, %v993_v46  ;;  %v995_v51 = vmul.f32 %v2499_v38, %v907_v20  ;;  %v1115_v52 = vpack.c.bf16 %v1099_v18, %v1097_v44 }
 0x1d6   : > { %v1038_v21 = vadd.f32 %v2501_v40, %v994_v48  ;;  %v1068_v54 = vmax.f32 %v1036_v47, 0.0 }
 0x1d7   : > { %v1039_v53 = vadd.f32 %v2503_v43, %v995_v51  ;;  %v1069_v56 = vmax.f32 %v1037_v50, 0.0 }
 0x1d8   : > { %v1070_v55 = vmax.f32 %v1038_v21, 0.0 }
 0x1d9   : > { %v1071_v57 = vmax.f32 %v1039_v53, 0.0  ;;  %v911_v58 = vpop.f32.mrb[4].mxu0 }
 0x1da   : > { %v1100_v59 = vpack.c.bf16 %v1070_v55, %v1068_v54  ;;  %v996_v61 = vmul.f32 %v2495_v35, %v911_v58  ;;  %v913_v62 = vpop.f32.mrb[5].mxu0 }
 0x1db   : > { %v997_v23 = vmul.f32 %v2499_v38, %v913_v62  ;;  %v915_v1 = vpop.f32.mrb[6].mxu0  ;;  %v1101_v24 = vpack.c.bf16 %v1071_v57, %v1069_v56 }
 0x1dc   : > { %v1040_v2 = vadd.f32 %v2501_v40, %v996_v61  ;;  %v998_v0 = vmul.f32 %v2495_v35, %v915_v1  ;;  %v917_v25 = vpop.f32.mrb[7].mxu0 }
 0x1dd   : > { %v1041_v3 = vadd.f32 %v2503_v43, %v997_v23  ;;  %v999_v5 = vmul.f32 %v2499_v38, %v917_v25  ;;  %1276 = vmatprep.mubr.bf16.mxu1 %v1101_v24 }
 0x1de   : > { %v1042_v6 = vadd.f32 %v2501_v40, %v998_v0  ;;  %1277 = vmatmul.mubr.bf16.vlgmr.msra.gmra.mrb[20].mxu1 %v1100_v59  ;;  %v1072_v27 = vmax.f32 %v1040_v2, 0.0 }
 0x1df   : > { %v1043_v8 = vadd.f32 %v2503_v43, %v999_v5  ;;  %v1073_v10 = vmax.f32 %v1041_v3, 0.0 }
 0x1e0   : > { %v1074_v9 = vmax.f32 %v1042_v6, 0.0 }
 0x1e1   : > { %v1075_v11 = vmax.f32 %v1043_v8, 0.0  ;;  %v921_v12 = vpop.f32.mrb[8].mxu0 }
 0x1e2   : > { %v1000_v13 = vmul.f32 %v2495_v35, %v921_v12  ;;  %v923_v14 = vpop.f32.mrb[9].mxu0  ;;  %v1102_v15 = vpack.c.bf16 %v1074_v9, %v1072_v27 }
 0x1e3   : > { %v1001_v22 = vmul.f32 %v2499_v38, %v923_v14  ;;  %v925_v17 = vpop.f32.mrb[10].mxu0  ;;  %v1103_v31 = vpack.c.bf16 %v1075_v11, %v1073_v10 }
 0x1e4   : > { %v1044_v28 = vadd.f32 %v2501_v40, %v1000_v13  ;;  %v1002_v32 = vmul.f32 %v2495_v35, %v925_v17  ;;  %v927_v29 = vpop.f32.mrb[11].mxu0  ;;  %v2125_v35 = vmov 0.0|0.0  }
 0x1e5   : > { %v1045_v30 = vadd.f32 %v2503_v43, %v1001_v22  ;;  %v1003_v34 = vmul.f32 %v2499_v38, %v927_v29  ;;  %1284 = vmatprep.mubr.bf16.mxu1 %v1103_v31  ;;  %1760 = vmatprep.subr.bf16.mxu1 %v2125_v35  ;;  %v2127_v38 = vmov 0.0  }
 0x1e6   : > { %v1046_v33 = vadd.f32 %v2501_v40, %v1002_v32  ;;  %1285 = vmatmul.mubr.bf16.gmra.mrb[24].mxu1 %v1102_v15  ;;  %v1076_v39 = vmax.f32 %v1044_v28, 0.0 }
 0x1e7   : > { %v1047_v37 = vadd.f32 %v2503_v43, %v1003_v34  ;;  %v1077_v36 = vmax.f32 %v1045_v30, 0.0 }
 0x1e8   : > { %v1078_v42 = vmax.f32 %v1046_v33, 0.0 }
 0x1e9   : > { %v1079_v44 = vmax.f32 %v1047_v37, 0.0 }
 0x1ea   : > { %v1104_v18 = vpack.c.bf16 %v1078_v42, %v1076_v39 }
 0x1eb   : > { %v1105_v46 = vpack.c.bf16 %v1079_v44, %v1077_v36 }
 0x1ed   : > { %1292 = vmatprep.mubr.bf16.mxu1 %v1105_v46 }
 0x1ee   : > { %1293 = vmatmul.mubr.bf16.gmra.mrb[28].mxu1 %v1104_v18 }
 0x1ef   : > { %1300 = vmatprep.mubr.bf16.mxu1 %v2517_v7 }
 0x1f6   : > { %1301 = vmatmul.mubr.bf16.gmra.mrb[32].mxu1 %v2514_v4  ;;  %v2609_v4 = vld [vmem:[%s2681_s5] ss:$0 sm:$0xff] }
 0x1f7   : > { %1308 = vmatprep.mubr.bf16.mxu1 %v2533_v45  ;;  %v2614_v45 = vld [vmem:[%s2682_s6] ss:$0 sm:$0xff] }
 0x1fe   : > { %1309 = vmatmul.mubr.bf16.gmra.mrb[36].mxu1 %v2529_v41 }
 0x1ff   : > { %1316 = vmatprep.mubr.bf16.mxu1 %v2549_v63 }
 0x206   : > { %1317 = vmatmul.mubr.bf16.gmra.mrb[40].mxu1 %v2545_v60 }
 0x207   : > { %1324 = vmatprep.mubr.bf16.mxu1 %v2565_v26 }
 0x20e   : > { %1325 = vmatmul.mubr.bf16.gmra.mrb[44].mxu1 %v2561_v16 }
 0x20f   : > { %1332 = vmatprep.mubr.bf16.mxu1 %v1115_v52 }
 0x216   : > { %1333 = vmatmul.mubr.bf16.gmra.mrb[48].mxu1 %v1114_v49 }
 0x217   : > { %1757 = vmatprep.mubr.msk.f32.mxu1 %vm2126_vm0, %v2127_v38 }
 0x2b1   : > { %v1660_v40 = vpop.f32.mrb[20].mxu1 }
 0x2b2   : > { %v1661_v43 = vpop.f32.mrb[21].mxu1 }
 0x2b3   : > { %v1662_v7 = vadd.f32 %v1661_v43, %v1660_v40  ;;  %v1663_v41 = vpop.f32.mrb[22].mxu1 }
 0x2b4   : > { %v1664_v60 = vpop.f32.mrb[23].mxu1 }
 0x2b5   : > { %v1348_v63 = vmul.f32 %v1662_v7, %v2609_v4  ;;  %v1665_v16 = vadd.f32 %v1664_v60, %v1663_v41 }
 0x2b7   : > { %v1371_v26 = vadd.f32 %v2614_v45, %v1348_v63  ;;  %v1349_v19 = vmul.f32 %v1665_v16, %v2609_v4 }
 0x2b9   : > { %v1372_v47 = vadd.f32 %v2614_v45, %v1349_v19  ;;  %v1666_v48 = vpop.f32.mrb[24].mxu1  ;;  %v1387_v49 = vmax.f32 %v1371_v26, 0.0 }
 0x2ba   : > { %v1667_v20 = vpop.f32.mrb[25].mxu1 }
 0x2bb   : > { %v1388_v50 = vmax.f32 %v1372_v47, 0.0  ;;  %v1668_v51 = vadd.f32 %v1667_v20, %v1666_v48  ;;  %v1669_v52 = vpop.f32.mrb[26].mxu1 }
 0x2bc   : > { %v1670_v21 = vpop.f32.mrb[27].mxu1 }
 0x2bd   : > { %v1761_v53 = vpack.c.bf16 %v1388_v50, %v1387_v49  ;;  %v1350_v54 = vmul.f32 %v1668_v51, %v2609_v4  ;;  %v1671_v55 = vadd.f32 %v1670_v21, %v1669_v52 }
 0x2bf   : > { %v1373_v56 = vadd.f32 %v2614_v45, %v1350_v54  ;;  %v1351_v57 = vmul.f32 %v1671_v55, %v2609_v4  ;;  %1762 = vmatpush3.bf16.xpose.msra.mxu1 %v1761_v53 }
 0x2c0   : > { %1763 = vmatprep.subr.bf16.mxu1 %v2125_v35 }
 0x2c1   : > { %v1374_v58 = vadd.f32 %v2614_v45, %v1351_v57  ;;  %v1672_v59 = vpop.f32.mrb[28].mxu1  ;;  %v1389_v62 = vmax.f32 %v1373_v56, 0.0 }
 0x2c2   : > { %v1673_v61 = vpop.f32.mrb[29].mxu1 }
 0x2c3   : > { %v1390_v23 = vmax.f32 %v1374_v58, 0.0  ;;  %v1674_v1 = vadd.f32 %v1673_v61, %v1672_v59  ;;  %v1675_v24 = vpop.f32.mrb[30].mxu1 }
 0x2c4   : > { %v1676_v2 = vpop.f32.mrb[31].mxu1 }
 0x2c5   : > { %v1764_v0 = vpack.c.bf16 %v1390_v23, %v1389_v62  ;;  %v1352_v25 = vmul.f32 %v1674_v1, %v2609_v4  ;;  %v1677_v3 = vadd.f32 %v1676_v2, %v1675_v24 }
 0x2c7   : > { %v1375_v5 = vadd.f32 %v2614_v45, %v1352_v25  ;;  %v1353_v6 = vmul.f32 %v1677_v3, %v2609_v4  ;;  %1765 = vmatpush3.bf16.xpose.msra.mxu1 %v1764_v0 }
 0x2c8   : > { %1766 = vmatprep.subr.bf16.mxu1 %v2125_v35 }
 0x2c9   : > { %v1376_v8 = vadd.f32 %v2614_v45, %v1353_v6  ;;  %v1678_v27 = vpop.f32.mrb[32].mxu1  ;;  %v1391_v10 = vmax.f32 %v1375_v5, 0.0 }
 0x2ca   : > { %v1679_v9 = vpop.f32.mrb[33].mxu1 }
 0x2cb   : > { %v1392_v11 = vmax.f32 %v1376_v8, 0.0  ;;  %v1680_v12 = vadd.f32 %v1679_v9, %v1678_v27  ;;  %v1681_v13 = vpop.f32.mrb[34].mxu1 }
 0x2cc   : > { %v1682_v14 = vpop.f32.mrb[35].mxu1 }
 0x2cd   : > { %v1767_v15 = vpack.c.bf16 %v1392_v11, %v1391_v10  ;;  %v1354_v22 = vmul.f32 %v1680_v12, %v2609_v4  ;;  %v1683_v17 = vadd.f32 %v1682_v14, %v1681_v13 }
 0x2cf   : > { %v1377_v31 = vadd.f32 %v2614_v45, %v1354_v22  ;;  %v1355_v28 = vmul.f32 %v1683_v17, %v2609_v4  ;;  %1768 = vmatpush3.bf16.xpose.msra.mxu1 %v1767_v15  ;;  %v1403_v15 = vld [vmem:[%s2683_s7] sm:$0x1]  ;;  %v1405_v22 = vstv %s1404_s26 }
 0x2d0   : > { %1769 = vmatprep.subr.bf16.mxu1 %v2125_v35 }
 0x2d1   : > { %v1378_v32 = vadd.f32 %v2614_v45, %v1355_v28  ;;  %v1684_v29 = vpop.f32.mrb[36].mxu1  ;;  %v1393_v34 = vmax.f32 %v1377_v31, 0.0 }
 0x2d2   : > { %v1685_v30 = vpop.f32.mrb[37].mxu1 }
 0x2d3   : > { %v1394_v33 = vmax.f32 %v1378_v32, 0.0  ;;  %v1686_v37 = vadd.f32 %v1685_v30, %v1684_v29  ;;  %v1687_v39 = vpop.f32.mrb[38].mxu1 }
 0x2d4   : > { %v1688_v42 = vpop.f32.mrb[39].mxu1 }
 0x2d5   : > { %v1770_v36 = vpack.c.bf16 %v1394_v33, %v1393_v34  ;;  %v1356_v44 = vmul.f32 %v1686_v37, %v2609_v4  ;;  %v1689_v18 = vadd.f32 %v1688_v42, %v1687_v39 }
 0x2d7   : > { %v1379_v46 = vadd.f32 %v2614_v45, %v1356_v44  ;;  %v1357_v38 = vmul.f32 %v1689_v18, %v2609_v4  ;;  %1771 = vmatpush3.bf16.xpose.msra.mxu1 %v1770_v36 }
 0x2d8   : > { %1772 = vmatprep.subr.bf16.mxu1 %v2125_v35 }
 0x2d9   : > { %v1380_v40 = vadd.f32 %v2614_v45, %v1357_v38  ;;  %v1690_v43 = vpop.f32.mrb[40].mxu1  ;;  %v1395_v41 = vmax.f32 %v1379_v46, 0.0 }
 0x2da   : > { %v1691_v7 = vpop.f32.mrb[41].mxu1 }
 0x2db   : > { %v1396_v60 = vmax.f32 %v1380_v40, 0.0  ;;  %v1692_v63 = vadd.f32 %v1691_v7, %v1690_v43  ;;  %v1693_v16 = vpop.f32.mrb[42].mxu1 }
 0x2dc   : > { %v1694_v26 = vpop.f32.mrb[43].mxu1 }
 0x2dd   : > { %v1773_v19 = vpack.c.bf16 %v1396_v60, %v1395_v41  ;;  %v1358_v47 = vmul.f32 %v1692_v63, %v2609_v4  ;;  %v1695_v48 = vadd.f32 %v1694_v26, %v1693_v16 }
 0x2df   : > { %v1381_v20 = vadd.f32 %v2614_v45, %v1358_v47  ;;  %v1359_v49 = vmul.f32 %v1695_v48, %v2609_v4  ;;  %1774 = vmatpush3.bf16.xpose.msra.mxu1 %v1773_v19 }
 0x2e0   : > { %1775 = vmatprep.subr.bf16.mxu1 %v2125_v35 }
 0x2e1   : > { %v1382_v50 = vadd.f32 %v2614_v45, %v1359_v49  ;;  %v1696_v51 = vpop.f32.mrb[44].mxu1  ;;  %v1397_v21 = vmax.f32 %v1381_v20, 0.0 }
 0x2e2   : > { %v1697_v52 = vpop.f32.mrb[45].mxu1 }
 0x2e3   : > { %v1398_v53 = vmax.f32 %v1382_v50, 0.0  ;;  %v1698_v54 = vadd.f32 %v1697_v52, %v1696_v51  ;;  %v1699_v55 = vpop.f32.mrb[46].mxu1 }
 0x2e4   : > { %v1700_v56 = vpop.f32.mrb[47].mxu1 }
 0x2e5   : > { %v1776_v57 = vpack.c.bf16 %v1398_v53, %v1397_v21  ;;  %v1360_v58 = vmul.f32 %v1698_v54, %v2609_v4  ;;  %v1701_v59 = vadd.f32 %v1700_v56, %v1699_v55 }
 0x2e7   : > { %v1383_v61 = vadd.f32 %v2614_v45, %v1360_v58  ;;  %v1361_v62 = vmul.f32 %v1701_v59, %v2609_v4  ;;  %1777 = vmatpush3.bf16.xpose.msra.mxu1 %v1776_v57 }
 0x2e8   : > { %1778 = vmatprep.subr.bf16.mxu1 %v2125_v35 }
 0x2e9   : > { %v1384_v23 = vadd.f32 %v2614_v45, %v1361_v62  ;;  %v1702_v1 = vpop.f32.mrb[48].mxu1  ;;  %v1399_v2 = vmax.f32 %v1383_v61, 0.0 }
 0x2ea   : > { %v1703_v24 = vpop.f32.mrb[49].mxu1 }
 0x2eb   : > { %v1400_v0 = vmax.f32 %v1384_v23, 0.0  ;;  %v1704_v25 = vadd.f32 %v1703_v24, %v1702_v1  ;;  %v1705_v3 = vpop.f32.mrb[50].mxu1 }
 0x2ec   : > { %v1706_v5 = vpop.f32.mrb[51].mxu1 }
 0x2ed   : > { %v1779_v6 = vpack.c.bf16 %v1400_v0, %v1399_v2  ;;  %v1362_v8 = vmul.f32 %v1704_v25, %v2609_v4  ;;  %v1707_v27 = vadd.f32 %v1706_v5, %v1705_v3 }
 0x2ef   : > { %v1385_v9 = vadd.f32 %v2614_v45, %v1362_v8  ;;  %v1363_v10 = vmul.f32 %v1707_v27, %v2609_v4  ;;  %1780 = vmatpush3.bf16.xpose.msra.mxu1 %v1779_v6 }
 0x2f0   : > { %1781 = vmatprep.subr.bf16.mxu1 %v2125_v35 }
 0x2f1   : > { %v1386_v11 = vadd.f32 %v2614_v45, %v1363_v10  ;;  %v1401_v12 = vmax.f32 %v1385_v9, 0.0 }
 0x2f3   : > { %v1402_v13 = vmax.f32 %v1386_v11, 0.0 }
 0x2f5   : > { %v1782_v14 = vpack.c.bf16 %v1402_v13, %v1401_v12 }
 0x2f7   : > { %1783 = vmatpush3.bf16.xpose.msra.mxu1 %v1782_v14 }
 0x2fe   : > { %1758 = vmatmul.mubr.f32.vlgmr.msra.gmra.mrb[52].mxu1 %v1403_v15 }
 0x3d1   : > { %v1472_v17 = vpop.f32.mrb[52].mxu1 }
 0x3d2   : > { %v1473_v4 = vadd.f32 %v1472_v17, %v1405_v22  ;;  %v1759_v31 = vpop.f32.mrb[53].mxu1 }
 0x3d4   : > { %v1476_v28 = vsub.f32 0.0, %v1473_v4 }
 0x3d6   : > { %v1477_v35 = vmul.f32 1.442695, %v1476_v28 }
 0x3d8   : > { %1987 = vpow2.f32 %v1477_v35 }
 0x3e2   : > { %v1988_v45 = vpop.eup %1987 }
 0x3e3   : > { %v1479_v32 = vadd.f32 1.0, %v1988_v45 }
 0x3e5   : > { %1989 = vrcp.f32 %v1479_v32 }
 0x3ef   : > { %v1990_v29 = vpop.eup %1989 }
 0x3f0   : > { %1482 = vst [vmem:[%s392_s18] sm:$0x1] %v1990_v29 }
 0x3f1 PF: > { %s2699_s25 = sld [smem:[#allocation10_spill]]  ;;  %p21_p6 = scmp.ge.s32.totalorder %s2203_s15, 5  }
 0x3f2   : > { %s2700_s11 = smov %s2105_s12  ;;  %s2701_s12 = smov %s2109_s13 }
 0x3f3   : > { %s2703_s14 = smov %s2203_s15  ;;  %23 = sbr.rel (!%p21_p6) target bundleno = 6 (0x6), region = 104 }
 0x3f7   : > { %s2702_s13 = smov %s2699_s25 }
 0x3fa   :  { %1500 = vsyncpa [#allocation4], 1 }
 0x3fb   :  { %1502 = vsyncpa [#allocation4 + $0x1], 1 }
 0x3fc   :  { %1503 = vsyncpa [#allocation6], 1 }

</bundles_post_ra>
